<compile_context>
chip_gen: v6e
topology: v6e:2x2x1
jax: 0.10.0
libtpu: 0.0.40
codegen_flags: <defaults>
</compile_context>

<pallas_src>
import jax
import jax.numpy as jnp
from jax.experimental import pallas as pl
from jax.experimental.pallas import tpu as pltpu


def _round_up(x, m):
    return ((x + m - 1) // m) * m


def _channel_matmul(w, x, b):
    """(O, K) @ (K, T) + b(O, 1) -> (O, T) with f32 accumulation.

    Tiny contractions (K <= 32 with few output rows) are unrolled lane-dense
    broadcast MACs on the VPU; anything with O >= 128 or K >= 64 goes to the
    otherwise-idle MXU so the VALU slots stay free for the gating math.
    """
    o, k = w.shape
    if k <= 32 and o < 128:
        acc = b + w[:, 0:1].astype(jnp.float32) * x[0:1, :].astype(jnp.float32)
        for i in range(1, k):
            acc = acc + (w[:, i:i + 1].astype(jnp.float32) *
                         x[i:i + 1, :].astype(jnp.float32))
        return acc
    return jnp.dot(w, x, preferred_element_type=jnp.float32) + b


def se_block1d_kernel(x_ref, w1t_ref, b1_ref, w2t_ref, b2_ref, o_ref):
    # x_ref: (C, t_hw) lane-dense tile of the NCHW input (HW on the lane axis).
    x = x_ref[...].astype(jnp.float32)                    # (C, T)
    # conv1 (1x1): h = W1^T @ x + b1, ReLU                -> (Cr, T)
    h = _channel_matmul(w1t_ref[...], x, b1_ref[...])
    h = jnp.maximum(h, 0.0)
    # conv2 (1x1): y = W2^T @ h + b2                      -> (C, T)
    y = _channel_matmul(w2t_ref[...], h, b2_ref[...])
    # sigmoid(y) == 0.5 * (tanh(y/2) + 1): single EUP op, exact math.
    gate = 0.5 * (jnp.tanh(0.5 * y) + 1.0)
    # SE gating
    o_ref[...] = (x * gate).astype(o_ref.dtype)


def _vmem_capacity_bytes():
    try:
        return int(pltpu.get_tpu_info().vmem_capacity_bytes)
    except Exception:
        return 64 * 1024 * 1024  # conservative fallback (v7x-sized VMEM)


def _pick_hw_tile(hw, c, n_batch, itemsize, tile_byte_cap):
    """Largest 128-multiple lane tile of the (padded) HW axis within the byte cap."""
    hw128 = _round_up(hw, 128)
    max_lanes = max(128, (tile_byte_cap // (itemsize * c)) // 128 * 128)
    t = min(max_lanes, hw128)
    # v7x has 2 TensorCores; keep >= 2 parallel grid steps when N == 1.
    if n_batch < 2 and hw128 > 128:
        t = min(t, max(128, _round_up(pl.cdiv(hw128, 2), 128)))
    return t


def se_block1d(x_nchw, w1, b1, w2, b2):
    """x_nchw: (N, C, H, W).  w1: (C, Cr), b1: (Cr,), w2: (Cr, C), b2: (C,)."""
    N, C, H, W = x_nchw.shape
    Cr = w1.shape[1]
    HW = H * W
    itemsize = jnp.dtype(x_nchw.dtype).itemsize

    # Generation-aware VMEM budget: ~3/4 of physical VMEM (capped at 100 MiB),
    # then 4 live tiles (double-buffered in + out) + headroom for the weights.
    vmem_cap = _vmem_capacity_bytes()
    vmem_limit = int(min(vmem_cap * 3 // 4, 100 * 1024 * 1024))
    tile_byte_cap = min(8 * 1024 * 1024,
                        max(C * 128 * itemsize, (vmem_limit - (4 << 20)) // 4))

    t_hw = _pick_hw_tile(HW, C, N, itemsize, tile_byte_cap)
    num_hw_tiles = pl.cdiv(HW, t_hw)
    hw_pad = num_hw_tiles * t_hw

    x3 = x_nchw.reshape(N, C, HW)                  # free view, HW lane-dense
    if hw_pad != HW:
        x3 = jnp.pad(x3, ((0, 0), (0, 0), (0, hw_pad - HW)))

    w1t = jnp.transpose(w1).astype(jnp.float32)    # (Cr, C)  -- tiny, cheap
    w2t = jnp.transpose(w2).astype(jnp.float32)    # (C, Cr)
    b1c = b1.reshape(Cr, 1).astype(jnp.float32)
    b2c = b2.reshape(C, 1).astype(jnp.float32)

    cost = pl.CostEstimate(
        flops=4 * N * HW * C * Cr + 2 * N * C * HW,
        transcendentals=N * C * HW,
        bytes_accessed=2 * N * C * HW * itemsize,
    )

    out3 = pl.pallas_call(
        se_block1d_kernel,
        out_shape=jax.ShapeDtypeStruct((N, C, hw_pad), x3.dtype),
        grid_spec=pltpu.PrefetchScalarGridSpec(
            num_scalar_prefetch=0,
            grid=(N, num_hw_tiles),
            in_specs=[
                pl.BlockSpec((pl.Squeezed(), C, t_hw), lambda n, j: (n, 0, j)),  # x tile
                pl.BlockSpec((Cr, C), lambda n, j: (0, 0)),                      # W1^T
                pl.BlockSpec((Cr, 1), lambda n, j: (0, 0)),                      # b1
                pl.BlockSpec((C, Cr), lambda n, j: (0, 0)),                      # W2^T
                pl.BlockSpec((C, 1), lambda n, j: (0, 0)),                       # b2
            ],
            out_specs=pl.BlockSpec((pl.Squeezed(), C, t_hw), lambda n, j: (n, 0, j)),
        ),
        compiler_params=pltpu.CompilerParams(
            dimension_semantics=("parallel", "parallel"),
            vmem_limit_bytes=vmem_limit),
        cost_estimate=cost,
    )(x3, w1t, b1c, w2t, b2c)

    if hw_pad != HW:
        out3 = out3[:, :, :HW]
    return out3.reshape(N, C, H, W)


def reference(x_nchw, w1, b1, w2, b2):
    # Pure-JAX reference of the same math, directly in NCHW.
    h = jnp.einsum("nchw,cr->nrhw", x_nchw, w1) + b1[None, :, None, None]
    h = jnp.maximum(h, 0.0)
    y = jnp.einsum("nrhw,rc->nchw", h, w2) + b2[None, :, None, None]
    y = jax.nn.sigmoid(y)
    return x_nchw * y


def _run_case(key, N, C, H, W, reduction):
    Cr = max(1, C // reduction)
    kx, k1, k2, k3, k4 = jax.random.split(key, 5)
    x = jax.random.normal(kx, (N, C, H, W), dtype=jnp.float32)
    w1 = jax.random.normal(k1, (C, Cr), dtype=jnp.float32) * 0.2
    b1 = jax.random.normal(k2, (Cr,), dtype=jnp.float32) * 0.1
    w2 = jax.random.normal(k3, (Cr, C), dtype=jnp.float32) * 0.2
    b2 = jax.random.normal(k4, (C,), dtype=jnp.float32) * 0.1

    out = jax.block_until_ready(se_block1d(x, w1, b1, w2, b2))
    ref = reference(x, w1, b1, w2, b2)
    assert out.shape == (N, C, H, W)
    # tanh-form sigmoid on the EUP differs from the reference only at ~1e-7;
    # 1e-4 tolerance leaves margin for hardware transcendental approximation.
    assert jnp.allclose(out, ref, atol=1e-4, rtol=1e-4), "mismatch vs reference"


if __name__ == "__main__":
    key = jax.random.PRNGKey(0)
    k_a, k_b = jax.random.split(key)

    # SE_block1D(channel=16, reduction=8) -> hidden Cr = 2.
    _run_case(k_a, N=2, C=16, H=16, W=16, reduction=8)
    # Awkward spatial size (HW = 90, not a multiple of 128) + N = 1 exercises
    # the padded-HW tail path and the min-2-tile split for v7x.
    _run_case(k_b, N=1, C=16, H=10, W=9, reduction=8)

    print("KERNEL_OK")
</pallas_src>

<mosaic_0001>
module attributes {stable_mosaic.version = 11 : i64} {
  func.func @se_block1d_kernel(%arg0: i32, %arg1: i32, %arg2: memref<1x16x256xf32, #tpu.memory_space<vmem>>, %arg3: memref<2x16xf32, #tpu.memory_space<vmem>>, %arg4: memref<2x1xf32, #tpu.memory_space<vmem>>, %arg5: memref<16x2xf32, #tpu.memory_space<vmem>>, %arg6: memref<16x1xf32, #tpu.memory_space<vmem>>, %arg7: memref<1x16x256xf32, #tpu.memory_space<vmem>>) attributes {dimension_semantics = [#tpu.dimension_semantics<parallel>, #tpu.dimension_semantics<parallel>], iteration_bounds = array<i64: 2, 1>, scalar_prefetch = 0 : i64, scratch_operands = 0 : i64, tpu.core_type = #tpu.core_type<tc>, window_params = [{transform_indices = @transform_0, window_bounds = array<i64: 1, 16, 256>}, {pipeline_mode = #tpu.pipeline_mode<synchronous>, transform_indices = @transform_1, window_bounds = array<i64: 2, 16>}, {pipeline_mode = #tpu.pipeline_mode<synchronous>, transform_indices = @transform_2, window_bounds = array<i64: 2, 1>}, {pipeline_mode = #tpu.pipeline_mode<synchronous>, transform_indices = @transform_3, window_bounds = array<i64: 16, 2>}, {pipeline_mode = #tpu.pipeline_mode<synchronous>, transform_indices = @transform_4, window_bounds = array<i64: 16, 1>}, {transform_indices = @transform_5, window_bounds = array<i64: 1, 16, 256>}]} {
    %c0 = arith.constant 0 : index
    %c0_0 = arith.constant 0 : index
    %c0_1 = arith.constant 0 : index
    %0 = vector.load %arg2[%c0, %c0_0, %c0_1] : memref<1x16x256xf32, #tpu.memory_space<vmem>>, vector<1x16x256xf32>
    %1 = vector.shape_cast %0 : vector<1x16x256xf32> to vector<16x256xf32>
    %c0_2 = arith.constant 0 : index
    %c0_3 = arith.constant 0 : index
    %2 = vector.load %arg3[%c0_2, %c0_3] : memref<2x16xf32, #tpu.memory_space<vmem>>, vector<2x16xf32>
    %c0_4 = arith.constant 0 : index
    %c0_5 = arith.constant 0 : index
    %3 = vector.load %arg4[%c0_4, %c0_5] : memref<2x1xf32, #tpu.memory_space<vmem>>, vector<2x1xf32>
    %4 = vector.extract_strided_slice %2 {offsets = [0, 0], sizes = [2, 1], strides = [1, 1]} : vector<2x16xf32> to vector<2x1xf32>
    %5 = vector.extract_strided_slice %1 {offsets = [0, 0], sizes = [1, 256], strides = [1, 1]} : vector<16x256xf32> to vector<1x256xf32>
    %6 = vector.broadcast %4 : vector<2x1xf32> to vector<2x256xf32>
    %7 = vector.broadcast %5 : vector<1x256xf32> to vector<2x256xf32>
    %8 = arith.mulf %6, %7 : vector<2x256xf32>
    %9 = vector.broadcast %3 : vector<2x1xf32> to vector<2x256xf32>
    %10 = arith.addf %9, %8 : vector<2x256xf32>
    %11 = vector.extract_strided_slice %2 {offsets = [0, 1], sizes = [2, 1], strides = [1, 1]} : vector<2x16xf32> to vector<2x1xf32>
    %12 = vector.extract_strided_slice %1 {offsets = [1, 0], sizes = [1, 256], strides = [1, 1]} : vector<16x256xf32> to vector<1x256xf32>
    %13 = vector.broadcast %11 : vector<2x1xf32> to vector<2x256xf32>
    %14 = vector.broadcast %12 : vector<1x256xf32> to vector<2x256xf32>
    %15 = arith.mulf %13, %14 : vector<2x256xf32>
    %16 = arith.addf %10, %15 : vector<2x256xf32>
    %17 = vector.extract_strided_slice %2 {offsets = [0, 2], sizes = [2, 1], strides = [1, 1]} : vector<2x16xf32> to vector<2x1xf32>
    %18 = vector.extract_strided_slice %1 {offsets = [2, 0], sizes = [1, 256], strides = [1, 1]} : vector<16x256xf32> to vector<1x256xf32>
    %19 = vector.broadcast %17 : vector<2x1xf32> to vector<2x256xf32>
    %20 = vector.broadcast %18 : vector<1x256xf32> to vector<2x256xf32>
    %21 = arith.mulf %19, %20 : vector<2x256xf32>
    %22 = arith.addf %16, %21 : vector<2x256xf32>
    %23 = vector.extract_strided_slice %2 {offsets = [0, 3], sizes = [2, 1], strides = [1, 1]} : vector<2x16xf32> to vector<2x1xf32>
    %24 = vector.extract_strided_slice %1 {offsets = [3, 0], sizes = [1, 256], strides = [1, 1]} : vector<16x256xf32> to vector<1x256xf32>
    %25 = vector.broadcast %23 : vector<2x1xf32> to vector<2x256xf32>
    %26 = vector.broadcast %24 : vector<1x256xf32> to vector<2x256xf32>
    %27 = arith.mulf %25, %26 : vector<2x256xf32>
    %28 = arith.addf %22, %27 : vector<2x256xf32>
    %29 = vector.extract_strided_slice %2 {offsets = [0, 4], sizes = [2, 1], strides = [1, 1]} : vector<2x16xf32> to vector<2x1xf32>
    %30 = vector.extract_strided_slice %1 {offsets = [4, 0], sizes = [1, 256], strides = [1, 1]} : vector<16x256xf32> to vector<1x256xf32>
    %31 = vector.broadcast %29 : vector<2x1xf32> to vector<2x256xf32>
    %32 = vector.broadcast %30 : vector<1x256xf32> to vector<2x256xf32>
    %33 = arith.mulf %31, %32 : vector<2x256xf32>
    %34 = arith.addf %28, %33 : vector<2x256xf32>
    %35 = vector.extract_strided_slice %2 {offsets = [0, 5], sizes = [2, 1], strides = [1, 1]} : vector<2x16xf32> to vector<2x1xf32>
    %36 = vector.extract_strided_slice %1 {offsets = [5, 0], sizes = [1, 256], strides = [1, 1]} : vector<16x256xf32> to vector<1x256xf32>
    %37 = vector.broadcast %35 : vector<2x1xf32> to vector<2x256xf32>
    %38 = vector.broadcast %36 : vector<1x256xf32> to vector<2x256xf32>
    %39 = arith.mulf %37, %38 : vector<2x256xf32>
    %40 = arith.addf %34, %39 : vector<2x256xf32>
    %41 = vector.extract_strided_slice %2 {offsets = [0, 6], sizes = [2, 1], strides = [1, 1]} : vector<2x16xf32> to vector<2x1xf32>
    %42 = vector.extract_strided_slice %1 {offsets = [6, 0], sizes = [1, 256], strides = [1, 1]} : vector<16x256xf32> to vector<1x256xf32>
    %43 = vector.broadcast %41 : vector<2x1xf32> to vector<2x256xf32>
    %44 = vector.broadcast %42 : vector<1x256xf32> to vector<2x256xf32>
    %45 = arith.mulf %43, %44 : vector<2x256xf32>
    %46 = arith.addf %40, %45 : vector<2x256xf32>
    %47 = vector.extract_strided_slice %2 {offsets = [0, 7], sizes = [2, 1], strides = [1, 1]} : vector<2x16xf32> to vector<2x1xf32>
    %48 = vector.extract_strided_slice %1 {offsets = [7, 0], sizes = [1, 256], strides = [1, 1]} : vector<16x256xf32> to vector<1x256xf32>
    %49 = vector.broadcast %47 : vector<2x1xf32> to vector<2x256xf32>
    %50 = vector.broadcast %48 : vector<1x256xf32> to vector<2x256xf32>
    %51 = arith.mulf %49, %50 : vector<2x256xf32>
    %52 = arith.addf %46, %51 : vector<2x256xf32>
    %53 = vector.extract_strided_slice %2 {offsets = [0, 8], sizes = [2, 1], strides = [1, 1]} : vector<2x16xf32> to vector<2x1xf32>
    %54 = vector.extract_strided_slice %1 {offsets = [8, 0], sizes = [1, 256], strides = [1, 1]} : vector<16x256xf32> to vector<1x256xf32>
    %55 = vector.broadcast %53 : vector<2x1xf32> to vector<2x256xf32>
    %56 = vector.broadcast %54 : vector<1x256xf32> to vector<2x256xf32>
    %57 = arith.mulf %55, %56 : vector<2x256xf32>
    %58 = arith.addf %52, %57 : vector<2x256xf32>
    %59 = vector.extract_strided_slice %2 {offsets = [0, 9], sizes = [2, 1], strides = [1, 1]} : vector<2x16xf32> to vector<2x1xf32>
    %60 = vector.extract_strided_slice %1 {offsets = [9, 0], sizes = [1, 256], strides = [1, 1]} : vector<16x256xf32> to vector<1x256xf32>
    %61 = vector.broadcast %59 : vector<2x1xf32> to vector<2x256xf32>
    %62 = vector.broadcast %60 : vector<1x256xf32> to vector<2x256xf32>
    %63 = arith.mulf %61, %62 : vector<2x256xf32>
    %64 = arith.addf %58, %63 : vector<2x256xf32>
    %65 = vector.extract_strided_slice %2 {offsets = [0, 10], sizes = [2, 1], strides = [1, 1]} : vector<2x16xf32> to vector<2x1xf32>
    %66 = vector.extract_strided_slice %1 {offsets = [10, 0], sizes = [1, 256], strides = [1, 1]} : vector<16x256xf32> to vector<1x256xf32>
    %67 = vector.broadcast %65 : vector<2x1xf32> to vector<2x256xf32>
    %68 = vector.broadcast %66 : vector<1x256xf32> to vector<2x256xf32>
    %69 = arith.mulf %67, %68 : vector<2x256xf32>
    %70 = arith.addf %64, %69 : vector<2x256xf32>
    %71 = vector.extract_strided_slice %2 {offsets = [0, 11], sizes = [2, 1], strides = [1, 1]} : vector<2x16xf32> to vector<2x1xf32>
    %72 = vector.extract_strided_slice %1 {offsets = [11, 0], sizes = [1, 256], strides = [1, 1]} : vector<16x256xf32> to vector<1x256xf32>
    %73 = vector.broadcast %71 : vector<2x1xf32> to vector<2x256xf32>
    %74 = vector.broadcast %72 : vector<1x256xf32> to vector<2x256xf32>
    %75 = arith.mulf %73, %74 : vector<2x256xf32>
    %76 = arith.addf %70, %75 : vector<2x256xf32>
    %77 = vector.extract_strided_slice %2 {offsets = [0, 12], sizes = [2, 1], strides = [1, 1]} : vector<2x16xf32> to vector<2x1xf32>
    %78 = vector.extract_strided_slice %1 {offsets = [12, 0], sizes = [1, 256], strides = [1, 1]} : vector<16x256xf32> to vector<1x256xf32>
    %79 = vector.broadcast %77 : vector<2x1xf32> to vector<2x256xf32>
    %80 = vector.broadcast %78 : vector<1x256xf32> to vector<2x256xf32>
    %81 = arith.mulf %79, %80 : vector<2x256xf32>
    %82 = arith.addf %76, %81 : vector<2x256xf32>
    %83 = vector.extract_strided_slice %2 {offsets = [0, 13], sizes = [2, 1], strides = [1, 1]} : vector<2x16xf32> to vector<2x1xf32>
    %84 = vector.extract_strided_slice %1 {offsets = [13, 0], sizes = [1, 256], strides = [1, 1]} : vector<16x256xf32> to vector<1x256xf32>
    %85 = vector.broadcast %83 : vector<2x1xf32> to vector<2x256xf32>
    %86 = vector.broadcast %84 : vector<1x256xf32> to vector<2x256xf32>
    %87 = arith.mulf %85, %86 : vector<2x256xf32>
    %88 = arith.addf %82, %87 : vector<2x256xf32>
    %89 = vector.extract_strided_slice %2 {offsets = [0, 14], sizes = [2, 1], strides = [1, 1]} : vector<2x16xf32> to vector<2x1xf32>
    %90 = vector.extract_strided_slice %1 {offsets = [14, 0], sizes = [1, 256], strides = [1, 1]} : vector<16x256xf32> to vector<1x256xf32>
    %91 = vector.broadcast %89 : vector<2x1xf32> to vector<2x256xf32>
    %92 = vector.broadcast %90 : vector<1x256xf32> to vector<2x256xf32>
    %93 = arith.mulf %91, %92 : vector<2x256xf32>
    %94 = arith.addf %88, %93 : vector<2x256xf32>
    %95 = vector.extract_strided_slice %2 {offsets = [0, 15], sizes = [2, 1], strides = [1, 1]} : vector<2x16xf32> to vector<2x1xf32>
    %96 = vector.extract_strided_slice %1 {offsets = [15, 0], sizes = [1, 256], strides = [1, 1]} : vector<16x256xf32> to vector<1x256xf32>
    %97 = vector.broadcast %95 : vector<2x1xf32> to vector<2x256xf32>
    %98 = vector.broadcast %96 : vector<1x256xf32> to vector<2x256xf32>
    %99 = arith.mulf %97, %98 : vector<2x256xf32>
    %100 = arith.addf %94, %99 : vector<2x256xf32>
    %cst = arith.constant 0.000000e+00 : f32
    %101 = vector.broadcast %cst : f32 to vector<2x256xf32>
    %102 = arith.maximumf %100, %101 : vector<2x256xf32>
    %c0_6 = arith.constant 0 : index
    %c0_7 = arith.constant 0 : index
    %103 = vector.load %arg5[%c0_6, %c0_7] : memref<16x2xf32, #tpu.memory_space<vmem>>, vector<16x2xf32>
    %c0_8 = arith.constant 0 : index
    %c0_9 = arith.constant 0 : index
    %104 = vector.load %arg6[%c0_8, %c0_9] : memref<16x1xf32, #tpu.memory_space<vmem>>, vector<16x1xf32>
    %105 = vector.extract_strided_slice %103 {offsets = [0, 0], sizes = [16, 1], strides = [1, 1]} : vector<16x2xf32> to vector<16x1xf32>
    %106 = vector.extract_strided_slice %102 {offsets = [0, 0], sizes = [1, 256], strides = [1, 1]} : vector<2x256xf32> to vector<1x256xf32>
    %107 = vector.broadcast %105 : vector<16x1xf32> to vector<16x256xf32>
    %108 = vector.broadcast %106 : vector<1x256xf32> to vector<16x256xf32>
    %109 = arith.mulf %107, %108 : vector<16x256xf32>
    %110 = vector.broadcast %104 : vector<16x1xf32> to vector<16x256xf32>
    %111 = arith.addf %110, %109 : vector<16x256xf32>
    %112 = vector.extract_strided_slice %103 {offsets = [0, 1], sizes = [16, 1], strides = [1, 1]} : vector<16x2xf32> to vector<16x1xf32>
    %113 = vector.extract_strided_slice %102 {offsets = [1, 0], sizes = [1, 256], strides = [1, 1]} : vector<2x256xf32> to vector<1x256xf32>
    %114 = vector.broadcast %112 : vector<16x1xf32> to vector<16x256xf32>
    %115 = vector.broadcast %113 : vector<1x256xf32> to vector<16x256xf32>
    %116 = arith.mulf %114, %115 : vector<16x256xf32>
    %117 = arith.addf %111, %116 : vector<16x256xf32>
    %cst_10 = arith.constant 5.000000e-01 : f32
    %118 = vector.broadcast %cst_10 : f32 to vector<16x256xf32>
    %119 = arith.mulf %118, %117 : vector<16x256xf32>
    %120 = math.tanh %119 : vector<16x256xf32>
    %cst_11 = arith.constant 1.000000e+00 : f32
    %121 = vector.broadcast %cst_11 : f32 to vector<16x256xf32>
    %122 = arith.addf %120, %121 : vector<16x256xf32>
    %cst_12 = arith.constant 5.000000e-01 : f32
    %123 = vector.broadcast %cst_12 : f32 to vector<16x256xf32>
    %124 = arith.mulf %123, %122 : vector<16x256xf32>
    %125 = arith.mulf %1, %124 : vector<16x256xf32>
    %c0_13 = arith.constant 0 : index
    %c0_14 = arith.constant 0 : index
    %c0_15 = arith.constant 0 : index
    %126 = vector.load %arg7[%c0_13, %c0_14, %c0_15] : memref<1x16x256xf32, #tpu.memory_space<vmem>>, vector<1x16x256xf32>
    %127 = vector.shape_cast %126 : vector<1x16x256xf32> to vector<16x256xf32>
    %128 = vector.shape_cast %125 : vector<16x256xf32> to vector<1x16x256xf32>
    tpu.vector_store %arg7[%c0_13, %c0_14, %c0_15], %128 {strides = array<i32>} : memref<1x16x256xf32, #tpu.memory_space<vmem>>, vector<1x16x256xf32>,
    return
  }
  func.func @transform_0(%arg0: i32, %arg1: i32) -> (i32, i32, i32) {
    %c0_i32 = arith.constant 0 : i32
    %c0_i32_0 = arith.constant 0 : i32
    return %arg0, %c0_i32, %arg1 : i32, i32, i32
  }
  func.func @transform_1(%arg0: i32, %arg1: i32) -> (i32, i32) {
    %c0_i32 = arith.constant 0 : i32
    %c0_i32_0 = arith.constant 0 : i32
    %c0_i32_1 = arith.constant 0 : i32
    return %c0_i32, %c0_i32_0 : i32, i32
  }
  func.func @transform_2(%arg0: i32, %arg1: i32) -> (i32, i32) {
    %c0_i32 = arith.constant 0 : i32
    %c0_i32_0 = arith.constant 0 : i32
    %c0_i32_1 = arith.constant 0 : i32
    return %c0_i32, %c0_i32_0 : i32, i32
  }
  func.func @transform_3(%arg0: i32, %arg1: i32) -> (i32, i32) {
    %c0_i32 = arith.constant 0 : i32
    %c0_i32_0 = arith.constant 0 : i32
    %c0_i32_1 = arith.constant 0 : i32
    return %c0_i32, %c0_i32_0 : i32, i32
  }
  func.func @transform_4(%arg0: i32, %arg1: i32) -> (i32, i32) {
    %c0_i32 = arith.constant 0 : i32
    %c0_i32_0 = arith.constant 0 : i32
    %c0_i32_1 = arith.constant 0 : i32
    return %c0_i32, %c0_i32_0 : i32, i32
  }
  func.func @transform_5(%arg0: i32, %arg1: i32) -> (i32, i32, i32) {
    %c0_i32 = arith.constant 0 : i32
    %c0_i32_0 = arith.constant 0 : i32
    return %arg0, %c0_i32, %arg1 : i32, i32, i32
  }
}

</mosaic_0001>

<bundles_post_ra>
// kernel: tpu_custom_call.1
= control target key start
LH: loop header
LB: loop body
LE: loop exit
PB: predicated region body
PF: predicated region fallthrough
CT: control target
= control target key end

     0   :  { %10 = vsyncpa [#allocation3], 0  ;;  %s1283_s0 = inlined_call_operand.hbm [shape: f32[2,16,256], index: 0, kind: input, shape index: {}]   ;;  %s1284_s1 = inlined_call_operand.vmem [shape: f32[2,16], index: 1, kind: input, shape index: {}]   ;;  %s1285_s2 = inlined_call_operand.vmem [shape: f32[2,1], index: 2, kind: input, shape index: {}]   ;;  %s1286_s3 = inlined_call_operand.vmem [shape: f32[16,2], index: 3, kind: input, shape index: {}]   ;;  %s1287_s4 = inlined_call_operand.vmem [shape: f32[16,1], index: 4, kind: input, shape index: {}]   ;;  %s1288_s5 = inlined_call_operand.hbm [shape: f32[2,16,256], index: 5, kind: output, shape index: {}]  }
   0x1   :  { %12 = vsyncpa [#allocation3 + $0x1], 0 }
   0x2   :  { %13 = vsyncpa [#allocation4], 0 }
   0x3   :  { %15 = vsyncpa [#allocation4 + $0x1], 0  ;;  %s1013_s18 = smov 0   ;;  %s1015_s19 = smov 0  }
   0x4   :  { %s1017_s20 = smov 0   ;;  %s1019_s21 = smov 0  }
   0x5   :  { %s1021_s22 = smov 0   ;;  %s1023_s23 = smov 0  }
   0x6 LB: > { %s724_s24 = sadd.s32 4294967295, %s959_s23   ;;  %s725_s25 = sadd.s32 4294967294, %s959_s23   ;;  %s959_s23 = sphi %s1023_s23, %s21_s23   ;;  %s955_s22 = sphi %s1021_s22, %s1299_s22   ;;  %s951_s21 = sphi %s1019_s21, %s1298_s21   ;;  %s947_s20 = sphi %s1017_s20, %s1297_s20   ;;  %s943_s19 = sphi %s1015_s19, %s1296_s19   ;;  %s939_s18 = sphi %s1013_s18, %s1295_s18  }
   0x7   : > { %s33_s26 = sadd.s32 1, %s955_s22  ;;  %s42_s27 = sadd.s32 1, %s947_s20 }
   0x8   : > { %p35_p0 = scmp.ge.s32.totalorder %s33_s26, 2  ;;  %p49_p1 = scmp.ne.s32.totalorder %s947_s20, %s943_s19 }
   0x9   : > { %p50_p2 = scmp.eq.s32.totalorder %s959_s23, 0  ;;  %p55_p3 = scmp.ne.s32.totalorder %s943_s19, %s939_s18 }
   0xa   : > { %s1301_s26 = smov (%p35_p0, %s33_s26), 0  ;;  %p56_p5 = scmp.eq.s32.totalorder %s724_s24, 0 }
   0xb   : > { %p1054_p4 = por %p50_p2, %p49_p1  ;;  %s37_s29 = ssub.s32 %s955_s22, %s1301_s26 }
   0xc   : > { %p165_p6 = scmp.eq.s32.totalorder %s724_s24, 1  ;;  %p40_p7 = scmp.eq.s32.totalorder %s37_s29, 0 }
   0xd   : > { %p1060_p8 = por %p56_p5, %p55_p3  ;;  %p171_p10 = scmp.eq.s32.totalorder %s725_s25, 1 }
   0xe   : > { %p1064_p9 = por %p165_p6, %p49_p1  ;;  %p753_p13 = scmp.lt.s32.totalorder %s959_s23, 2 }
   0xf   : > { %s1069_s7 = scalar_select %p40_p7, %s947_s20, %s42_s27  }
  0x10   : > { %p1071_p11 = por %p171_p10, %p55_p3  ;;  %s203_s9 = sand.u32 1, %s947_s20  }
  0x11   : > { %s728_s10 = sshll.u32 %s203_s9, 5  ;;  %s739_s11 = sshll.u32 %s955_s22, 9 }
  0x12   : > { %s215_s14 = scalar_lea.hbm %s1283_s0, %s739_s11  ;;  %s207_s15 = scalar_lea.vmem [#allocation2], %s728_s10 }
  0x13   : > { %s216_s16 = sshll.u32 %s207_s15, 4  ;;  %p1084_p0 = pnand %p753_p13, %p1054_p4  ;;  %s217_s16 = int_to_ptr.vmem [resolvable:$true] %s216_s16 }
  0x14   : > { %p731_p1 = scmp.ge.s32.totalorder %s959_s23, 1  ;;  %s204_s24 = scalar_lea.sflag [#allocation3], %s203_s9 }
  0x15   : > { %p853_p2 = pneg %p1084_p0  ;;  %s864_s25 = scalar_lea.vmem %s217_s16, 512 }
  0x16   : > { %p865_p3 = scmp.ne.s32.totalorder %s217_s16, %s864_s25  ;;  %s961_s27 = smov [#allocation2]  }
  0x17   : > { %s869_s29 = sshll.u32 %s961_s27, 4  ;;  %s870_s29 = int_to_ptr.vmem [resolvable:$false] %s869_s29 }
  0x18   : > { %p867_p5 = pnand %p865_p3, %p853_p2  ;;  %s871_s10 = scalar_lea.vmem %s870_s29, 1024 }
  0x19   : > { %p872_p7 = scmp.lt.s32.totalorder %s217_s16, %s870_s29  ;;  %p873_p10 = scmp.lt.s32.totalorder %s871_s10, %s864_s25 }
  0x1a   : > { %p868_p6 = pneg %p867_p5 }
  0x1b   : > { %p874_p12 = por %p873_p10, %p872_p7 }
  0x1d   : > { %p875_p4 = pnand %p874_p12, %p868_p6 }
  0x1f   : > { %878 = shalt.err (!%p875_p4)
}
  0x20   : > { %s962_s28 = smov 256   ;;  %s963_s9 = smov 16  }
  0x21   : > { %748 = dma.hbm_to_vmem [thread:$0]  (!%p1084_p0), %s215_s14, 512, %s217_s16, %s204_s24, %s962_s28, %s962_s28, %s963_s9  }
  0x22   : > { %p224_p13 = scmp.lt.s32.totalorder %s959_s23, 3 }
  0x24   : > { %p225_p2 = pnand %p731_p1, %p224_p13 }
  0x25   : > { %s1097_s11 = sand.u32 (!%p225_p2), 1, %s943_s19  }
  0x26   : > { %228 = sbr.rel (%p225_p2) target bundleno = 274 (0x112), region = 40  ;;  %s732_s12 = sshll.u32 (!%p225_p2), %s1097_s11, 5 }
  0x27   : > { %s231_s13 = scalar_lea.sflag (!%p225_p2), [#allocation3], %s1097_s11  ;;  %s1103_s15 = scalar_lea.vmem (!%p225_p2), [#allocation2], %s732_s12 }
  0x2b   : > { %930 = dma.done.wait (%p1060_p8), %s231_s13, 512  }
  0x2c   : > { %932 = vsyncadd (%p1060_p8), %s231_s13, 4294966784  ;;  %v964_v0 = vmov 1   ;;  %v965_v1 = vmov 0   ;;  %v267_v2 = vld [vmem:[%s1284_s1] sm:$0x3]  ;;  %v966_v4 = vmov 2   ;;  %v274_v22 = vlaneseq }
  0x2d   : > { %824 = vset.pattern.permute.xlu1 %v964_v0  ;;  %823 = vset.pattern.permute.xlu0 %v965_v1  ;;  %v268_v3 = vld [vmem:[%s1285_s2] sm:$0x3]  ;;  %v967_v5 = vmov 3   ;;  %v968_v6 = vmov 4   ;;  %v969_v7 = vmov 6   ;;  %v970_v8 = vmov 5  }
  0x2e   : > { %292 = vperm.xlu1 %824, %v267_v2   ;;  %271 = vperm.xlu0 %823, %v267_v2   ;;  %v971_v9 = vmov 9   ;;  %v972_v10 = vmov 7   ;;  %v973_v11 = vmov 12   ;;  %v974_v12 = vmov 8   ;;  %v535_v15 = vld [vmem:[%s1287_s4] sm:$0xff]  ;;  %v534_v17 = vld [vmem:[%s1286_s3 + $0x8] sm:$0xff] }
  0x2f   : > { %v975_v13 = vmov 15   ;;  %v976_v14 = vmov 10   ;;  %v977_v16 = vmov 11   ;;  %v978_v18 = vmov 13   ;;  %v533_v20 = vld [vmem:[%s1286_s3] sm:$0xff]  ;;  %v536_v21 = vld [vmem:[%s1287_s4 + $0x8] sm:$0xff] }
  0x30   : > { %v979_v19 = vmov 14   ;;  %v275_v23 = vshrl.u32 %v274_v22, 7  ;;  %v1130_v25 = vld [vmem:[%s1103_s15] sm:$0xff]  ;;  %v1133_v26 = vld [vmem:[%s1103_s15 + $0x8] sm:$0xff]  ;;  %s740_s14 = sshll.u32 %s951_s21, 9  ;;  %s622_s21 = scalar_lea.sflag [#allocation4], %s1097_s11 }
  0x31   : > { %s1232_s30 = scalar_lea.hbm %s1288_s5, %s740_s14  ;;  %s980_s25 = smov [#allocation5]  }
  0x32   : > { %825 = vset.pattern.permute.xlu1 %v966_v4  ;;  %286 = vperm.xlu0 %823, %v268_v3   ;;  %v1127_v24 = vsub.s32 0, %v275_v23  ;;  %v1135_v27 = vsub.s32 1, %v275_v23  ;;  %v1141_v30 = vsub.s32 2, %v275_v23  ;;  %v1151_v39 = vsub.s32 3, %v275_v23  ;;  %s883_s27 = sshll.u32 %s980_s25, 4  ;;  %s884_s27 = int_to_ptr.vmem [resolvable:$false] %s883_s27 }
  0x33   : > { %308 = vperm.xlu1 %825, %v267_v2   ;;  %v1153_v41 = vsub.s32 4, %v275_v23  ;;  %v1159_v53 = vsub.s32 5, %v275_v23  ;;  %v1165_v62 = vsub.s32 6, %v275_v23  ;;  %s885_s29 = scalar_lea.vmem %s884_s27, 1024 }
  0x34   : > { %v277_v28 = vrot.slane %v1130_v25, %v1127_v24  ;;  %v281_v29 = vrot.slane %v1133_v26, %v1127_v24  ;;  %v298_v33 = vrot.slane %v1130_v25, %v1135_v27  ;;  %v302_v34 = vrot.slane %v1133_v26, %v1135_v27 }
  0x35   : > { %v314_v37 = vrot.slane %v1130_v25, %v1141_v30  ;;  %v318_v38 = vrot.slane %v1133_v26, %v1141_v30  ;;  %v330_v49 = vrot.slane %v1130_v25, %v1151_v39  ;;  %v334_v50 = vrot.slane %v1133_v26, %v1151_v39 }
  0x36   : > { %826 = vset.pattern.permute.xlu0 %v967_v5  ;;  %v346_v54 = vrot.slane %v1130_v25, %v1153_v41  ;;  %v350_v55 = vrot.slane %v1133_v26, %v1153_v41  ;;  %v362_v63 = vrot.slane %v1130_v25, %v1159_v53  ;;  %v1171_v5 = vsub.s32 7, %v275_v23 }
  0x37   : > { %827 = vset.pattern.permute.xlu1 %v968_v6  ;;  %324 = vperm.xlu0 %826, %v267_v2   ;;  %v378_v6 = vrot.slane %v1130_v25, %v1165_v62 }
  0x38   : > { %340 = vperm.xlu1 %827, %v267_v2  }
  0x3b   : > { %829 = vset.pattern.permute.xlu0 %v969_v7  ;;  %v382_v7 = vrot.slane %v1133_v26, %v1165_v62 }
  0x3c   : > { %828 = vset.pattern.permute.xlu1 %v970_v8  ;;  %372 = vperm.xlu0 %829, %v267_v2  }
  0x3d   : > { %356 = vperm.xlu1 %828, %v267_v2  }
  0x40   : > { %832 = vset.pattern.permute.xlu0 %v971_v9 }
  0x41   : > { %830 = vset.pattern.permute.xlu1 %v972_v10  ;;  %420 = vperm.xlu0 %832, %v267_v2  }
  0x42   : > { %388 = vperm.xlu1 %830, %v267_v2  }
  0x45   : > { %835 = vset.pattern.permute.xlu0 %v973_v11 }
  0x46   : > { %831 = vset.pattern.permute.xlu1 %v974_v12  ;;  %468 = vperm.xlu0 %835, %v267_v2  }
  0x47   : > { %404 = vperm.xlu1 %831, %v267_v2  }
  0x4a   : > { %838 = vset.pattern.permute.xlu0 %v975_v13 }
  0x4b   : > { %833 = vset.pattern.permute.xlu1 %v976_v14  ;;  %516 = vperm.xlu0 %838, %v267_v2   ;;  %v394_v14 = vrot.slane %v1130_v25, %v1171_v5 }
  0x4c   : > { %436 = vperm.xlu1 %833, %v267_v2  }
  0x4f   : > { %840 = vset.pattern.permute.xlu0 %v965_v1 }
  0x50   : > { %834 = vset.pattern.permute.xlu1 %v977_v16  ;;  %561 = vperm.xlu0 %840, %v535_v15   ;;  %v398_v15 = vrot.slane %v1133_v26, %v1171_v5 }
  0x51   : > { %452 = vperm.xlu1 %834, %v267_v2  }
  0x54   : > { %842 = vset.pattern.permute.xlu0 %v964_v0 }
  0x55   : > { %836 = vset.pattern.permute.xlu1 %v978_v18  ;;  %578 = vperm.xlu0 %842, %v534_v17  }
  0x56   : > { %484 = vperm.xlu1 %836, %v267_v2  }
  0x5a   : > { %837 = vset.pattern.permute.xlu1 %v979_v19 }
  0x5b   : > { %500 = vperm.xlu1 %837, %v267_v2  }
  0x5f   : > { %839 = vset.pattern.permute.xlu1 %v965_v1 }
  0x60   : > { %539 = vperm.xlu1 %839, %v533_v20  }
  0x64   : > { %544 = vperm.xlu1 %839, %v534_v17  }
  0x68   : > { %566 = vperm.xlu1 %839, %v536_v21   ;;  %v1185_v21 = vld [vmem:[%s1103_s15 + $0x18] sm:$0xff] }
  0x6c   : > { %841 = vset.pattern.permute.xlu1 %v964_v0  ;;  %v366_v0 = vrot.slane %v1133_v26, %v1159_v53 }
  0x6d   : > { %574 = vperm.xlu1 %841, %v533_v20   ;;  %v1182_v20 = vld [vmem:[%s1103_s15 + $0x10] sm:$0xff]  ;;  %s260_s15 = scalar_lea.vmem [#allocation5], %s732_s12 }
  0x6e   : > { %v410_v23 = vrot.slane %v1182_v20, %v1127_v24  ;;  %s637_s16 = sshll.u32 %s260_s15, 4  ;;  %s1234_s16 = int_to_ptr.vmem [resolvable:$true] %s637_s16 }
  0x6f   : > { %s879_s12 = scalar_lea.vmem %s1234_s16, 512  ;;  %p886_p1 = scmp.lt.s32.totalorder %s1234_s16, %s884_s27 }
  0x70   : > { %p880_p8 = scmp.ne.s32.totalorder %s1234_s16, %s879_s12  ;;  %p887_p3 = scmp.lt.s32.totalorder %s885_s29, %s879_s12 }
  0x72   : > { %p881_p12 = pnand %p880_p8, %p1064_p9  ;;  %p888_p5 = por %p887_p3, %p886_p1 }
  0x74   : > { %p882_p0 = pneg %p881_p12 }
  0x76   : > { %p889_p6 = pnand %p888_p5, %p882_p0 }
  0xa9   : > { %v293_v31 = vpop.permute.xlu1 %292  ;;  %v272_v32 = vpop.permute.xlu0 %271 }
  0xaa   : > { %v282_v35 = vmul.f32 %v277_v28, %v272_v32  ;;  %v283_v36 = vmul.f32 %v281_v29, %v272_v32  ;;  %v303_v42 = vmul.f32 %v298_v33, %v293_v31  ;;  %v304_v43 = vmul.f32 %v302_v34, %v293_v31 }
  0xab   : > { %v414_v28 = vrot.slane %v1185_v21, %v1127_v24  ;;  %v426_v34 = vrot.slane %v1182_v20, %v1135_v27 }
  0xad   : > { %v287_v40 = vpop.permute.xlu0 %286 }
  0xae   : > { %v289_v44 = vadd.f32 %v287_v40, %v282_v35  ;;  %v290_v45 = vadd.f32 %v287_v40, %v283_v36  ;;  %v309_v46 = vpop.permute.xlu1 %308  ;;  %v430_v35 = vrot.slane %v1185_v21, %v1135_v27 }
  0xaf   : > { %v319_v47 = vmul.f32 %v314_v37, %v309_v46  ;;  %v320_v48 = vmul.f32 %v318_v38, %v309_v46 }
  0xb0   : > { %v305_v51 = vadd.f32 %v303_v42, %v289_v44  ;;  %v306_v52 = vadd.f32 %v304_v43, %v290_v45  ;;  %v442_v44 = vrot.slane %v1182_v20, %v1141_v30  ;;  %v446_v45 = vrot.slane %v1185_v21, %v1141_v30 }
  0xb1   : > { %v478_v30 = vrot.slane %v1185_v21, %v1153_v41 }
  0xb2   : > { %v321_v56 = vadd.f32 %v319_v47, %v305_v51  ;;  %v322_v57 = vadd.f32 %v320_v48, %v306_v52  ;;  %v325_v58 = vpop.permute.xlu0 %324  ;;  %v458_v51 = vrot.slane %v1182_v20, %v1151_v39  ;;  %v462_v52 = vrot.slane %v1185_v21, %v1151_v39 }
  0xb3   : > { %v335_v59 = vmul.f32 %v330_v49, %v325_v58  ;;  %v336_v60 = vmul.f32 %v334_v50, %v325_v58  ;;  %v341_v61 = vpop.permute.xlu1 %340  ;;  %v474_v58 = vrot.slane %v1182_v20, %v1153_v41  ;;  %v494_v39 = vrot.slane %v1185_v21, %v1159_v53 }
  0xb4   : > { %v351_v3 = vmul.f32 %v346_v54, %v341_v61  ;;  %v352_v4 = vmul.f32 %v350_v55, %v341_v61  ;;  %v506_v41 = vrot.slane %v1182_v20, %v1165_v62 }
  0xb5   : > { %v337_v1 = vadd.f32 %v335_v59, %v321_v56  ;;  %v338_v2 = vadd.f32 %v336_v60, %v322_v57 }
  0xb7   : > { %v373_v9 = vpop.permute.xlu0 %372  ;;  %v353_v10 = vadd.f32 %v351_v3, %v337_v1  ;;  %v354_v11 = vadd.f32 %v352_v4, %v338_v2  ;;  %v490_v2 = vrot.slane %v1182_v20, %v1159_v53 }
  0xb8   : > { %v357_v8 = vpop.permute.xlu1 %356  ;;  %v383_v18 = vmul.f32 %v378_v6, %v373_v9  ;;  %v384_v19 = vmul.f32 %v382_v7, %v373_v9  ;;  %v510_v9 = vrot.slane %v1185_v21, %v1165_v62 }
  0xb9   : > { %v367_v12 = vmul.f32 %v362_v63, %v357_v8  ;;  %v368_v13 = vmul.f32 %v366_v0, %v357_v8 }
  0xbb   : > { %v369_v16 = vadd.f32 %v367_v12, %v353_v10  ;;  %v370_v17 = vadd.f32 %v368_v13, %v354_v11  ;;  %v522_v10 = vrot.slane %v1182_v20, %v1171_v5  ;;  %v526_v11 = vrot.slane %v1185_v21, %v1171_v5 }
  0xbc   : > { %v421_v37 = vpop.permute.xlu0 %420 }
  0xbd   : > { %v389_v22 = vpop.permute.xlu1 %388  ;;  %v385_v29 = vadd.f32 %v383_v18, %v369_v16  ;;  %v386_v31 = vadd.f32 %v384_v19, %v370_v17  ;;  %v431_v48 = vmul.f32 %v426_v34, %v421_v37  ;;  %v432_v49 = vmul.f32 %v430_v35, %v421_v37 }
  0xbe   : > { %v399_v32 = vmul.f32 %v394_v14, %v389_v22  ;;  %v400_v33 = vmul.f32 %v398_v15, %v389_v22 }
  0xc0   : > { %v401_v38 = vadd.f32 %v399_v32, %v385_v29  ;;  %v402_v40 = vadd.f32 %v400_v33, %v386_v31 }
  0xc1   : > { %v469_v60 = vpop.permute.xlu0 %468 }
  0xc2   : > { %v405_v36 = vpop.permute.xlu1 %404  ;;  %v479_v6 = vmul.f32 %v474_v58, %v469_v60  ;;  %v480_v7 = vmul.f32 %v478_v30, %v469_v60 }
  0xc3   : > { %v415_v42 = vmul.f32 %v410_v23, %v405_v36  ;;  %v416_v43 = vmul.f32 %v414_v28, %v405_v36 }
  0xc5   : > { %v417_v46 = vadd.f32 %v415_v42, %v401_v38  ;;  %v418_v47 = vadd.f32 %v416_v43, %v402_v40 }
  0xc6   : > { %v517_v15 = vpop.permute.xlu0 %516 }
  0xc7   : > { %v437_v50 = vpop.permute.xlu1 %436  ;;  %v433_v54 = vadd.f32 %v431_v48, %v417_v46  ;;  %v434_v55 = vadd.f32 %v432_v49, %v418_v47  ;;  %v527_v17 = vmul.f32 %v522_v10, %v517_v15  ;;  %v528_v18 = vmul.f32 %v526_v11, %v517_v15 }
  0xc8   : > { %v447_v56 = vmul.f32 %v442_v44, %v437_v50  ;;  %v448_v57 = vmul.f32 %v446_v45, %v437_v50 }
  0xca   : > { %v449_v61 = vadd.f32 %v447_v56, %v433_v54  ;;  %v450_v63 = vadd.f32 %v448_v57, %v434_v55 }
  0xcb   : > { %v562_v34 = vpop.permute.xlu0 %561 }
  0xcc   : > { %v453_v59 = vpop.permute.xlu1 %452 }
  0xcd   : > { %v463_v0 = vmul.f32 %v458_v51, %v453_v59  ;;  %v464_v1 = vmul.f32 %v462_v52, %v453_v59 }
  0xcf   : > { %v465_v3 = vadd.f32 %v463_v0, %v449_v61  ;;  %v466_v4 = vadd.f32 %v464_v1, %v450_v63 }
  0xd0   : > { %v579_v45 = vpop.permute.xlu0 %578 }
  0xd1   : > { %v485_v8 = vpop.permute.xlu1 %484  ;;  %v481_v12 = vadd.f32 %v479_v6, %v465_v3  ;;  %v482_v13 = vadd.f32 %v480_v7, %v466_v4 }
  0xd2   : > { %v495_v53 = vmul.f32 %v490_v2, %v485_v8  ;;  %v496_v14 = vmul.f32 %v494_v39, %v485_v8 }
  0xd4   : > { %v497_v19 = vadd.f32 %v495_v53, %v481_v12  ;;  %v498_v22 = vadd.f32 %v496_v14, %v482_v13 }
  0xd6   : > { %v501_v16 = vpop.permute.xlu1 %500 }
  0xd7   : > { %v511_v23 = vmul.f32 %v506_v41, %v501_v16  ;;  %v512_v28 = vmul.f32 %v510_v9, %v501_v16 }
  0xd9   : > { %v513_v29 = vadd.f32 %v511_v23, %v497_v19  ;;  %v514_v62 = vadd.f32 %v512_v28, %v498_v22 }
  0xdb   : > { %v529_v31 = vadd.f32 %v527_v17, %v513_v29  ;;  %v530_v32 = vadd.f32 %v528_v18, %v514_v62  ;;  %v540_v33 = vpop.permute.xlu1 %539 }
  0xdd   : > { %v531_v35 = vmax.f32 %v529_v31, 0.0  ;;  %v532_v5 = vmax.f32 %v530_v32, 0.0 }
  0xdf   : > { %v550_v36 = vrot.slane %v531_v35, %v1127_v24  ;;  %v554_v37 = vrot.slane %v532_v5, %v1127_v24  ;;  %v545_v38 = vpop.permute.xlu1 %544  ;;  %v584_v40 = vrot.slane %v531_v35, %v1135_v27  ;;  %v588_v42 = vrot.slane %v532_v5, %v1135_v27 }
  0xe1   : > { %v557_v43 = vmul.f32 %v550_v36, %v545_v38  ;;  %v558_v44 = vmul.f32 %v554_v37, %v545_v38  ;;  %v591_v47 = vmul.f32 %v584_v40, %v579_v45  ;;  %v592_v48 = vmul.f32 %v588_v42, %v579_v45 }
  0xe2   : > { %v555_v51 = vmul.f32 %v550_v36, %v540_v33  ;;  %v556_v52 = vmul.f32 %v554_v37, %v540_v33 }
  0xe3   : > { %v567_v46 = vpop.permute.xlu1 %566 }
  0xe4   : > { %v571_v49 = vadd.f32 %v567_v46, %v557_v43  ;;  %v572_v50 = vadd.f32 %v567_v46, %v558_v44  ;;  %v569_v58 = vadd.f32 %v562_v34, %v555_v51  ;;  %v570_v30 = vadd.f32 %v562_v34, %v556_v52 }
  0xe6   : > { %v595_v54 = vadd.f32 %v591_v47, %v571_v49  ;;  %v596_v55 = vadd.f32 %v592_v48, %v572_v50 }
  0xe8   : > { %v599_v56 = vmul.f32 0.5, %v595_v54  ;;  %v600_v57 = vmul.f32 0.5, %v596_v55  ;;  %v575_v24 = vpop.permute.xlu1 %574 }
  0xe9   : > { %v589_v59 = vmul.f32 %v584_v40, %v575_v24  ;;  %v590_v60 = vmul.f32 %v588_v42, %v575_v24 }
  0xea   : > { %843 = vtanh.f32 %v599_v56 }
  0xeb   : > { %845 = vtanh.f32 %v600_v57  ;;  %v593_v27 = vadd.f32 %v589_v59, %v569_v58  ;;  %v594_v61 = vadd.f32 %v590_v60, %v570_v30 }
  0xed   : > { %v597_v63 = vmul.f32 0.5, %v593_v27  ;;  %v598_v0 = vmul.f32 0.5, %v594_v61 }
  0xef   : > { %847 = vtanh.f32 %v597_v63 }
  0xf0   : > { %849 = vtanh.f32 %v598_v0 }
  0xf7   : > { %v844_v1 = vpop.eup %843 }
  0xf8   : > { %v846_v2 = vpop.eup %845  ;;  %v607_v39 = vadd.f32 1.0, %v844_v1 }
  0xf9   : > { %v608_v3 = vadd.f32 1.0, %v846_v2 }
  0xfa   : > { %v611_v4 = vmul.f32 0.5, %v607_v39 }
  0xfb   : > { %v612_v6 = vmul.f32 0.5, %v608_v3 }
  0xfc   : > { %v848_v7 = vpop.eup %847  ;;  %v615_v8 = vmul.f32 %v611_v4, %v1182_v20 }
  0xfd   : > { %v850_v41 = vpop.eup %849  ;;  %v616_v9 = vmul.f32 %v612_v6, %v1185_v21  ;;  %v605_v10 = vadd.f32 1.0, %v848_v7 }
  0xfe   : > { %619 = vst [vmem:[%s260_s15 + $0x10] sm:$0xff] %v615_v8  ;;  %v606_v11 = vadd.f32 1.0, %v850_v41 }
  0xff   : > { %620 = vst [vmem:[%s260_s15 + $0x18] sm:$0xff] %v616_v9  ;;  %v609_v12 = vmul.f32 0.5, %v605_v10 }
 0x100   : > { %v610_v13 = vmul.f32 0.5, %v606_v11 }
 0x101   : > { %v613_v53 = vmul.f32 %v609_v12, %v1130_v25 }
 0x102   : > { %v614_v20 = vmul.f32 %v610_v13, %v1133_v26 }
 0x103   : > { %617 = vst [vmem:[%s260_s15] sm:$0xff] %v613_v53 }
 0x104   : > { %618 = vst [vmem:[%s260_s15 + $0x8] sm:$0xff] %v614_v20 }
 0x105   : > { %892 = shalt.err (!%p889_p6)
}
 0x106   : > { %s893_s10 = scalar_lea.hbm %s1232_s30, 512  ;;  %s897_s13 = scalar_lea.hbm %s1288_s5, 1024 }
 0x107   : > { %p894_p7 = scmp.ne.s32.totalorder %s1232_s30, %s893_s10  ;;  %p898_p13 = scmp.lt.s32.totalorder %s1232_s30, %s1288_s5 }
 0x108   : > { %p899_p2 = scmp.lt.s32.totalorder %s897_s13, %s893_s10 }
 0x109   : > { %p895_p10 = pnand %p894_p7, %p1064_p9 }
 0x10a   : > { %p900_p8 = por %p899_p2, %p898_p13 }
 0x10b   : > { %p896_p4 = pneg %p895_p10 }
 0x10d   : > { %p901_p12 = pnand %p900_p8, %p896_p4 }
 0x10f   : > { %904 = shalt.err (!%p901_p12)
}
 0x110   : > { %s981_s17 = smov 256   ;;  %s982_s24 = smov 16  }
 0x111   : > { %743 = dma.vmem_to_hbm [thread:$0]  (%p1064_p9), %s1234_s16, 512, %s1232_s30, %s622_s21, %s981_s17, %s981_s17, %s982_s24  }
 0x112 PF: > { %s652_s12 = sand.u32 1, %s939_s18   ;;  %p1294_p0 = scmp.ge.s32.totalorder %s959_s23, 2 }
 0x113   : > { %s653_s25 = scalar_lea.sflag [#allocation4], %s652_s12 }
 0x114   : > { %p750_p1 = pnand %p1294_p0, %p1071_p11 }
 0x116   : > { %p751_p3 = pneg %p750_p1 }
 0x118   : > { %934 = dma.done.wait (%p751_p3), %s653_s25, 512  }
 0x119   : > { %936 = vsyncadd (%p751_p3), %s653_s25, 4294966784  ;;  %s21_s23 = sadd.s32 1, %s959_s23   ;;  %s1295_s18 = smov %s943_s19 }
 0x11a   : > { %p18_p5 = scmp.ge.s32.totalorder %s21_s23, 4   ;;  %s1296_s19 = smov %s947_s20 }
 0x11b   : > { %s1297_s20 = smov %s1069_s7  ;;  %s1298_s21 = smov %s955_s22 }
 0x11c   : > { %s1299_s22 = smov %s1301_s26  ;;  %20 = sbr.rel (!%p18_p5) target bundleno = 6 (0x6), region = 85 }
 0x121   :  { %658 = vsyncpa [#allocation3], 1 }
 0x122   :  { %660 = vsyncpa [#allocation3 + $0x1], 1 }
 0x123   :  { %661 = vsyncpa [#allocation4], 1 }
 0x124   :  { %663 = vsyncpa [#allocation4 + $0x1], 1 }

</bundles_post_ra>
